<compile_context>
chip_gen: v5e
topology: v5e:2x2
jax: 0.10.0
libtpu: 0.0.40
codegen_flags: <defaults>
</compile_context>

<pallas_src>
import functools

import jax
import jax.numpy as jnp
from jax.experimental import pallas as pl
from jax.experimental.pallas import tpu as pltpu

IMAGE_SIZE = 784
DIMS = [IMAGE_SIZE, 256, 128, 64, 10]


def _mlp_kernel(x_ref,
                w0_ref, b0_ref,
                w1_ref, b1_ref,
                w2_ref, b2_ref,
                w3_ref, b3_ref,
                o_ref):
    # fc0 + ReLU (dropout is identity at inference).  x arrives f32 and is
    # cast to bf16 here (VPU work, hidden under the x DMA); MXU accumulates
    # in f32 via preferred_element_type.
    x = x_ref[...].astype(jnp.bfloat16)
    h = jnp.dot(x, w0_ref[...], preferred_element_type=jnp.float32)
    h = jnp.maximum(h + b0_ref[...], 0.0)
    # fc1 + ReLU
    h = jnp.dot(h.astype(jnp.bfloat16), w1_ref[...],
                preferred_element_type=jnp.float32)
    h = jnp.maximum(h + b1_ref[...], 0.0)
    # fc2 + ReLU
    h = jnp.dot(h.astype(jnp.bfloat16), w2_ref[...],
                preferred_element_type=jnp.float32)
    h = jnp.maximum(h + b2_ref[...], 0.0)
    # fc3 + ReLU (the PyTorch module really does ReLU the final logits)
    h = jnp.dot(h.astype(jnp.bfloat16), w3_ref[...],
                preferred_element_type=jnp.float32)
    logits = jnp.maximum(h + b3_ref[...], 0.0)
    # log_softmax along the feature axis (dim=1 in torch), all in f32.
    m = jnp.max(logits, axis=-1, keepdims=True)
    s = logits - m
    lse = jnp.log(jnp.sum(jnp.exp(s), axis=-1, keepdims=True))
    o_ref[...] = (s - lse).astype(o_ref.dtype)


def _round_up(n, m):
    return ((n + m - 1) // m) * m


def _choose_block(batch, block_b):
    """Batch tile: multiple of 128 when the batch allows it, >= 2 grid steps
    for v7x's two TensorCores, and never (meaningfully) larger than the
    batch itself."""
    blk = min(block_b, _round_up(batch, 128))
    if batch >= 256 and pl.cdiv(batch, blk) < 2:
        blk = _round_up(pl.cdiv(batch, 2), 128)
    return min(blk, _round_up(batch, 8))


def prepare_params(params):
    """One-time conversion to kernel layout: weights (in, out) in bf16,
    biases (1, out) in f32.  Do this ONCE outside the per-call path.

    NOTE: torch nn.Linear stores weight as (out, in); importing a real
    checkpoint requires a transpose to the (in, out) layout used here."""
    return tuple(
        (jnp.asarray(w, jnp.bfloat16),
         jnp.asarray(b, jnp.float32).reshape(1, -1))
        for w, b in params)


@functools.partial(jax.jit, static_argnames=("block_b",))
def my_model_forward(x, prepared_params, block_b=1024):
    """x: any shape whose trailing elements flatten to multiples of 784
    (e.g. (B, 1, 28, 28)), matching torch's x.view(-1, 784).
    prepared_params: output of prepare_params()."""
    x2d = x.reshape(-1, IMAGE_SIZE)          # metadata-only reshape
    B = x2d.shape[0]

    eff_block = _choose_block(B, block_b)
    grid = (pl.cdiv(B, eff_block),)          # ragged last block is masked

    (w0, b0), (w1, b1), (w2, b2), (w3, b3) = prepared_params

    def resident(arr):
        # Whole-array block, constant index map: stays resident in VMEM.
        nd = arr.ndim
        return pl.BlockSpec(arr.shape, lambda i, _nd=nd: (0,) * _nd)

    # Advisory cost hint for XLA scheduling around the custom call.
    flops = 2 * B * (IMAGE_SIZE * 256 + 256 * 128 + 128 * 64 + 64 * 10)
    bytes_accessed = (
        x2d.size * x2d.dtype.itemsize
        + sum(w.size * w.dtype.itemsize + b.size * b.dtype.itemsize
              for w, b in prepared_params)
        + B * DIMS[-1] * 4)
    cost = pl.CostEstimate(flops=flops,
                           transcendentals=B * DIMS[-1],
                           bytes_accessed=bytes_accessed)

    return pl.pallas_call(
        _mlp_kernel,
        out_shape=jax.ShapeDtypeStruct((B, DIMS[-1]), jnp.float32),
        grid_spec=pl.GridSpec(
            grid=grid,
            in_specs=[
                pl.BlockSpec((eff_block, IMAGE_SIZE), lambda i: (i, 0)),
                resident(w0), resident(b0),
                resident(w1), resident(b1),
                resident(w2), resident(b2),
                resident(w3), resident(b3),
            ],
            out_specs=pl.BlockSpec((eff_block, DIMS[-1]), lambda i: (i, 0)),
        ),
        compiler_params=pltpu.CompilerParams(
            dimension_semantics=("parallel",)),
        cost_estimate=cost,
    )(x2d, w0, b0, w1, b1, w2, b2, w3, b3)


def init_params(key):
    """Deterministic init mimicking nn.Linear (uniform +-1/sqrt(fan_in)).
    Weights stored as (in, out) so the kernel computes x @ W; biases (1, out)."""
    params = []
    for i in range(4):
        fan_in, fan_out = DIMS[i], DIMS[i + 1]
        key, kw, kb = jax.random.split(key, 3)
        bound = 1.0 / jnp.sqrt(fan_in)
        w = jax.random.uniform(kw, (fan_in, fan_out), jnp.float32, -bound, bound)
        b = jax.random.uniform(kb, (1, fan_out), jnp.float32, -bound, bound)
        params.append((w, b))
    return params


def reference_forward(x, params):
    """Pure-JAX reference mirroring the kernel math (bf16 matmul operands,
    f32 accumulation and f32 epilogue, ReLU on the final logits)."""
    h = x.reshape(-1, IMAGE_SIZE).astype(jnp.float32)
    for w, b in params:
        h = jnp.dot(h.astype(jnp.bfloat16), w.astype(jnp.bfloat16),
                    preferred_element_type=jnp.float32)
        h = jnp.maximum(h + b, 0.0)
    return jax.nn.log_softmax(h, axis=1)


if __name__ == "__main__":
    key = jax.random.PRNGKey(0)
    kp, kx = jax.random.split(key)
    params = init_params(kp)
    kernel_params = prepare_params(params)   # one-time weight prep

    # Small MNIST-like batch: (B, C, H, W) = (8, 1, 28, 28)
    x = jax.random.normal(kx, (8, 1, 28, 28), jnp.float32)

    out = jax.block_until_ready(my_model_forward(x, kernel_params))

    ref = reference_forward(x, params)
    assert out.shape == (8, 10)
    assert bool(jnp.all(jnp.isfinite(out)))
    assert jnp.allclose(out, ref, atol=1e-3, rtol=1e-3), float(
        jnp.max(jnp.abs(out - ref)))

    print("KERNEL_OK")
</pallas_src>

<mosaic_0001>
module attributes {stable_mosaic.version = 11 : i64} {
  func.func @_mlp_kernel(%arg0: i32, %arg1: memref<8x784xf32, #tpu.memory_space<vmem>>, %arg2: memref<784x256xbf16, #tpu.memory_space<vmem>>, %arg3: memref<1x256xf32, #tpu.memory_space<vmem>>, %arg4: memref<256x128xbf16, #tpu.memory_space<vmem>>, %arg5: memref<1x128xf32, #tpu.memory_space<vmem>>, %arg6: memref<128x64xbf16, #tpu.memory_space<vmem>>, %arg7: memref<1x64xf32, #tpu.memory_space<vmem>>, %arg8: memref<64x10xbf16, #tpu.memory_space<vmem>>, %arg9: memref<1x10xf32, #tpu.memory_space<vmem>>, %arg10: memref<8x10xf32, #tpu.memory_space<vmem>>) attributes {dimension_semantics = [#tpu.dimension_semantics<parallel>], iteration_bounds = array<i64: 1>, scalar_prefetch = 0 : i64, scratch_operands = 0 : i64, tpu.core_type = #tpu.core_type<tc>, window_params = [{transform_indices = @transform_0, window_bounds = array<i64: 8, 784>}, {pipeline_mode = #tpu.pipeline_mode<synchronous>, transform_indices = @transform_1, window_bounds = array<i64: 784, 256>}, {pipeline_mode = #tpu.pipeline_mode<synchronous>, transform_indices = @transform_2, window_bounds = array<i64: 1, 256>}, {pipeline_mode = #tpu.pipeline_mode<synchronous>, transform_indices = @transform_3, window_bounds = array<i64: 256, 128>}, {pipeline_mode = #tpu.pipeline_mode<synchronous>, transform_indices = @transform_4, window_bounds = array<i64: 1, 128>}, {pipeline_mode = #tpu.pipeline_mode<synchronous>, transform_indices = @transform_5, window_bounds = array<i64: 128, 64>}, {pipeline_mode = #tpu.pipeline_mode<synchronous>, transform_indices = @transform_6, window_bounds = array<i64: 1, 64>}, {pipeline_mode = #tpu.pipeline_mode<synchronous>, transform_indices = @transform_7, window_bounds = array<i64: 64, 10>}, {pipeline_mode = #tpu.pipeline_mode<synchronous>, transform_indices = @transform_8, window_bounds = array<i64: 1, 10>}, {transform_indices = @transform_9, window_bounds = array<i64: 8, 10>}]} {
    %c0 = arith.constant 0 : index
    %c0_0 = arith.constant 0 : index
    %0 = vector.load %arg1[%c0, %c0_0] : memref<8x784xf32, #tpu.memory_space<vmem>>, vector<8x784xf32>
    %1 = arith.truncf %0 : vector<8x784xf32> to vector<8x784xbf16>
    %c0_1 = arith.constant 0 : index
    %c0_2 = arith.constant 0 : index
    %2 = vector.load %arg2[%c0_1, %c0_2] : memref<784x256xbf16, #tpu.memory_space<vmem>>, vector<784x256xbf16>
    %cst = arith.constant dense<0.000000e+00> : vector<8x256xf32>
    %3 = tpu.matmul %1, %2, %cst {dimension_numbers = #tpu.dot_dimension_numbers<[1], [0], [0], [1], [0, 0, 1, 1], [], []>} : vector<8x784xbf16>, vector<784x256xbf16>, vector<8x256xf32> -> vector<8x256xf32>
    %c0_3 = arith.constant 0 : index
    %c0_4 = arith.constant 0 : index
    %4 = vector.load %arg3[%c0_3, %c0_4] : memref<1x256xf32, #tpu.memory_space<vmem>>, vector<1x256xf32>
    %5 = vector.broadcast %4 : vector<1x256xf32> to vector<8x256xf32>
    %6 = arith.addf %3, %5 : vector<8x256xf32>
    %cst_5 = arith.constant 0.000000e+00 : f32
    %7 = vector.broadcast %cst_5 : f32 to vector<8x256xf32>
    %8 = arith.maximumf %6, %7 : vector<8x256xf32>
    %9 = arith.truncf %8 : vector<8x256xf32> to vector<8x256xbf16>
    %c0_6 = arith.constant 0 : index
    %c0_7 = arith.constant 0 : index
    %10 = vector.load %arg4[%c0_6, %c0_7] : memref<256x128xbf16, #tpu.memory_space<vmem>>, vector<256x128xbf16>
    %cst_8 = arith.constant dense<0.000000e+00> : vector<8x128xf32>
    %11 = tpu.matmul %9, %10, %cst_8 {dimension_numbers = #tpu.dot_dimension_numbers<[1], [0], [0], [1], [0, 0, 1, 1], [], []>} : vector<8x256xbf16>, vector<256x128xbf16>, vector<8x128xf32> -> vector<8x128xf32>
    %c0_9 = arith.constant 0 : index
    %c0_10 = arith.constant 0 : index
    %12 = vector.load %arg5[%c0_9, %c0_10] : memref<1x128xf32, #tpu.memory_space<vmem>>, vector<1x128xf32>
    %13 = vector.broadcast %12 : vector<1x128xf32> to vector<8x128xf32>
    %14 = arith.addf %11, %13 : vector<8x128xf32>
    %cst_11 = arith.constant 0.000000e+00 : f32
    %15 = vector.broadcast %cst_11 : f32 to vector<8x128xf32>
    %16 = arith.maximumf %14, %15 : vector<8x128xf32>
    %17 = arith.truncf %16 : vector<8x128xf32> to vector<8x128xbf16>
    %c0_12 = arith.constant 0 : index
    %c0_13 = arith.constant 0 : index
    %18 = vector.load %arg6[%c0_12, %c0_13] : memref<128x64xbf16, #tpu.memory_space<vmem>>, vector<128x64xbf16>
    %cst_14 = arith.constant dense<0.000000e+00> : vector<8x64xf32>
    %19 = tpu.matmul %17, %18, %cst_14 {dimension_numbers = #tpu.dot_dimension_numbers<[1], [0], [0], [1], [0, 0, 1, 1], [], []>} : vector<8x128xbf16>, vector<128x64xbf16>, vector<8x64xf32> -> vector<8x64xf32>
    %c0_15 = arith.constant 0 : index
    %c0_16 = arith.constant 0 : index
    %20 = vector.load %arg7[%c0_15, %c0_16] : memref<1x64xf32, #tpu.memory_space<vmem>>, vector<1x64xf32>
    %21 = vector.broadcast %20 : vector<1x64xf32> to vector<8x64xf32>
    %22 = arith.addf %19, %21 : vector<8x64xf32>
    %cst_17 = arith.constant 0.000000e+00 : f32
    %23 = vector.broadcast %cst_17 : f32 to vector<8x64xf32>
    %24 = arith.maximumf %22, %23 : vector<8x64xf32>
    %25 = arith.truncf %24 : vector<8x64xf32> to vector<8x64xbf16>
    %c0_18 = arith.constant 0 : index
    %c0_19 = arith.constant 0 : index
    %26 = vector.load %arg8[%c0_18, %c0_19] : memref<64x10xbf16, #tpu.memory_space<vmem>>, vector<64x10xbf16>
    %cst_20 = arith.constant dense<0.000000e+00> : vector<8x10xf32>
    %27 = tpu.matmul %25, %26, %cst_20 {dimension_numbers = #tpu.dot_dimension_numbers<[1], [0], [0], [1], [0, 0, 1, 1], [], []>} : vector<8x64xbf16>, vector<64x10xbf16>, vector<8x10xf32> -> vector<8x10xf32>
    %c0_21 = arith.constant 0 : index
    %c0_22 = arith.constant 0 : index
    %28 = vector.load %arg9[%c0_21, %c0_22] : memref<1x10xf32, #tpu.memory_space<vmem>>, vector<1x10xf32>
    %29 = vector.broadcast %28 : vector<1x10xf32> to vector<8x10xf32>
    %30 = arith.addf %27, %29 : vector<8x10xf32>
    %cst_23 = arith.constant 0.000000e+00 : f32
    %31 = vector.broadcast %cst_23 : f32 to vector<8x10xf32>
    %32 = arith.maximumf %30, %31 : vector<8x10xf32>
    %cst_24 = arith.constant dense<0xFF800000> : vector<8xf32>
    %33 = vector.multi_reduction <maximumf>, %32, %cst_24 [1] : vector<8x10xf32> to vector<8xf32>
    %34 = vector.shape_cast %33 : vector<8xf32> to vector<8x1xf32>
    %35 = vector.broadcast %34 : vector<8x1xf32> to vector<8x10xf32>
    %36 = arith.subf %32, %35 : vector<8x10xf32>
    %37 = math.exp %36 : vector<8x10xf32>
    %cst_25 = arith.constant dense<0.000000e+00> : vector<8xf32>
    %38 = vector.multi_reduction <add>, %37, %cst_25 [1] : vector<8x10xf32> to vector<8xf32>
    %39 = vector.shape_cast %38 : vector<8xf32> to vector<8x1xf32>
    %40 = math.log %39 : vector<8x1xf32>
    %41 = vector.broadcast %40 : vector<8x1xf32> to vector<8x10xf32>
    %42 = arith.subf %36, %41 : vector<8x10xf32>
    %c0_26 = arith.constant 0 : index
    %c0_27 = arith.constant 0 : index
    %43 = vector.load %arg10[%c0_26, %c0_27] : memref<8x10xf32, #tpu.memory_space<vmem>>, vector<8x10xf32>
    tpu.vector_store %arg10[%c0_26, %c0_27], %42 {strides = array<i32>} : memref<8x10xf32, #tpu.memory_space<vmem>>, vector<8x10xf32>,
    return
  }
  func.func @transform_0(%arg0: i32) -> (i32, i32) {
    %c0_i32 = arith.constant 0 : i32
    %c0_i32_0 = arith.constant 0 : i32
    return %arg0, %c0_i32 : i32, i32
  }
  func.func @transform_1(%arg0: i32) -> (i32, i32) {
    %c0_i32 = arith.constant 0 : i32
    %c0_i32_0 = arith.constant 0 : i32
    %c0_i32_1 = arith.constant 0 : i32
    return %c0_i32, %c0_i32_0 : i32, i32
  }
  func.func @transform_2(%arg0: i32) -> (i32, i32) {
    %c0_i32 = arith.constant 0 : i32
    %c0_i32_0 = arith.constant 0 : i32
    %c0_i32_1 = arith.constant 0 : i32
    return %c0_i32, %c0_i32_0 : i32, i32
  }
  func.func @transform_3(%arg0: i32) -> (i32, i32) {
    %c0_i32 = arith.constant 0 : i32
    %c0_i32_0 = arith.constant 0 : i32
    %c0_i32_1 = arith.constant 0 : i32
    return %c0_i32, %c0_i32_0 : i32, i32
  }
  func.func @transform_4(%arg0: i32) -> (i32, i32) {
    %c0_i32 = arith.constant 0 : i32
    %c0_i32_0 = arith.constant 0 : i32
    %c0_i32_1 = arith.constant 0 : i32
    return %c0_i32, %c0_i32_0 : i32, i32
  }
  func.func @transform_5(%arg0: i32) -> (i32, i32) {
    %c0_i32 = arith.constant 0 : i32
    %c0_i32_0 = arith.constant 0 : i32
    %c0_i32_1 = arith.constant 0 : i32
    return %c0_i32, %c0_i32_0 : i32, i32
  }
  func.func @transform_6(%arg0: i32) -> (i32, i32) {
    %c0_i32 = arith.constant 0 : i32
    %c0_i32_0 = arith.constant 0 : i32
    %c0_i32_1 = arith.constant 0 : i32
    return %c0_i32, %c0_i32_0 : i32, i32
  }
  func.func @transform_7(%arg0: i32) -> (i32, i32) {
    %c0_i32 = arith.constant 0 : i32
    %c0_i32_0 = arith.constant 0 : i32
    %c0_i32_1 = arith.constant 0 : i32
    return %c0_i32, %c0_i32_0 : i32, i32
  }
  func.func @transform_8(%arg0: i32) -> (i32, i32) {
    %c0_i32 = arith.constant 0 : i32
    %c0_i32_0 = arith.constant 0 : i32
    %c0_i32_1 = arith.constant 0 : i32
    return %c0_i32, %c0_i32_0 : i32, i32
  }
  func.func @transform_9(%arg0: i32) -> (i32, i32) {
    %c0_i32 = arith.constant 0 : i32
    %c0_i32_0 = arith.constant 0 : i32
    return %arg0, %c0_i32 : i32, i32
  }
}

</mosaic_0001>

<bundles_post_ra>
// kernel: my_model_forward.1
= control target key start
LH: loop header
LB: loop body
LE: loop exit
PB: predicated region body
PF: predicated region fallthrough
CT: control target
= control target key end

     0   :  { %vm642_vm0 = vcmask 130048   ;;  %s2618_s0 = inlined_call_operand.vmem [shape: f32[8,784], index: 0, kind: input, shape index: {}]   ;;  %s2619_s1 = inlined_call_operand.vmem [shape: bf16[784,256], index: 1, kind: input, shape index: {}]   ;;  %s2620_s2 = inlined_call_operand.vmem [shape: f32[1,256], index: 2, kind: input, shape index: {}]   ;;  %s2621_s3 = inlined_call_operand.vmem [shape: bf16[256,128], index: 3, kind: input, shape index: {}]   ;;  %s2622_s4 = inlined_call_operand.vmem [shape: f32[1,128], index: 4, kind: input, shape index: {}]   ;;  %s2623_s5 = inlined_call_operand.vmem [shape: bf16[128,64], index: 5, kind: input, shape index: {}]   ;;  %s2624_s6 = inlined_call_operand.vmem [shape: f32[1,64], index: 6, kind: input, shape index: {}]   ;;  %s2625_s7 = inlined_call_operand.vmem [shape: bf16[64,10], index: 7, kind: input, shape index: {}]   ;;  %s2626_s8 = inlined_call_operand.vmem [shape: f32[1,10], index: 8, kind: input, shape index: {}]   ;;  %s2627_s9 = inlined_call_operand.hbm [shape: f32[8,10], index: 9, kind: output, shape index: {}]  }
   0x1   :  { %v1217_v0 = vld [vmem:[%s2619_s1 + $0x70] sm:$0xf]  ;;  %v1681_v1 = vld [vmem:[%s2619_s1 + $0x74] sm:$0xf0]  ;;  %v1209_v11 = vld [vmem:[%s2619_s1 + $0x60] sm:$0xf] }
   0x2   :  { %v1345_v2 = vld [vmem:[%s2619_s1 + $0x170] sm:$0xf]  ;;  %v1218_v3 = vor.u32 %v1681_v1, %v1217_v0  ;;  %v1713_v4 = vld [vmem:[%s2619_s1 + $0x174] sm:$0xf0]  ;;  %v1679_v13 = vld [vmem:[%s2619_s1 + $0x64] sm:$0xf0] }
   0x3   :  { %v1409_v5 = vld [vmem:[%s2619_s1 + $0x1f0] sm:$0xf]  ;;  %v1729_v6 = vld [vmem:[%s2619_s1 + $0x1f4] sm:$0xf0]  ;;  %v1346_v7 = vor.u32 %v1713_v4, %v1345_v2  ;;  %v1337_v14 = vld [vmem:[%s2619_s1 + $0x160] sm:$0xf]  ;;  %v1210_v16 = vor.u32 %v1679_v13, %v1209_v11 }
   0x4   :  { %v1410_v8 = vor.u32 %v1729_v6, %v1409_v5  ;;  %v1281_v9 = vld [vmem:[%s2619_s1 + $0xf0] sm:$0xf]  ;;  %v1697_v10 = vld [vmem:[%s2619_s1 + $0xf4] sm:$0xf0]  ;;  %646 = vmatpush.bf16.msra.mxu0 %v1218_v3  ;;  %v1711_v15 = vld [vmem:[%s2619_s1 + $0x164] sm:$0xf0] }
   0x5   :  { %v1282_v12 = vor.u32 %v1697_v10, %v1281_v9  ;;  %672 = vmatpush.bf16.msra.mxu2 %v1346_v7  ;;  %v1338_v17 = vor.u32 %v1711_v15, %v1337_v14  ;;  %v1401_v18 = vld [vmem:[%s2619_s1 + $0x1e0] sm:$0xf]  ;;  %v1727_v19 = vld [vmem:[%s2619_s1 + $0x1e4] sm:$0xf0]  ;;  %v1201_v23 = vld [vmem:[%s2619_s1 + $0x50] sm:$0xf] }
   0x6   :  { %685 = vmatpush.bf16.msra.mxu3 %v1410_v8  ;;  %v1273_v20 = vld [vmem:[%s2619_s1 + $0xe0] sm:$0xf]  ;;  %v1402_v21 = vor.u32 %v1727_v19, %v1401_v18  ;;  %v1695_v22 = vld [vmem:[%s2619_s1 + $0xe4] sm:$0xf0]  ;;  %v1677_v24 = vld [vmem:[%s2619_s1 + $0x54] sm:$0xf0] }
   0x7   :  { %659 = vmatpush.bf16.msra.mxu1 %v1282_v12  ;;  %v1274_v25 = vor.u32 %v1695_v22, %v1273_v20  ;;  %v1329_v26 = vld [vmem:[%s2619_s1 + $0x150] sm:$0xf]  ;;  %v1709_v27 = vld [vmem:[%s2619_s1 + $0x154] sm:$0xf0]  ;;  %v1202_v29 = vor.u32 %v1677_v24, %v1201_v23  ;;  %v1193_v35 = vld [vmem:[%s2619_s1 + $0x40] sm:$0xf] }
   0x8   :  { %v1393_v28 = vld [vmem:[%s2619_s1 + $0x1d0] sm:$0xf]  ;;  %647 = vmatpush.bf16.msra.mxu0 %v1210_v16  ;;  %v1725_v30 = vld [vmem:[%s2619_s1 + $0x1d4] sm:$0xf0]  ;;  %v1330_v33 = vor.u32 %v1709_v27, %v1329_v26  ;;  %v1675_v36 = vld [vmem:[%s2619_s1 + $0x44] sm:$0xf0] }
   0x9   :  { %v1265_v31 = vld [vmem:[%s2619_s1 + $0xd0] sm:$0xf]  ;;  %v1693_v32 = vld [vmem:[%s2619_s1 + $0xd4] sm:$0xf0]  ;;  %673 = vmatpush.bf16.msra.mxu2 %v1338_v17  ;;  %v1394_v34 = vor.u32 %v1725_v30, %v1393_v28  ;;  %v1321_v37 = vld [vmem:[%s2619_s1 + $0x140] sm:$0xf]  ;;  %v1194_v44 = vor.u32 %v1675_v36, %v1193_v35 }
   0xa   :  { %686 = vmatpush.bf16.msra.mxu3 %v1402_v21  ;;  %v1266_v38 = vor.u32 %v1693_v32, %v1265_v31  ;;  %v1707_v39 = vld [vmem:[%s2619_s1 + $0x144] sm:$0xf0]  ;;  %v1385_v40 = vld [vmem:[%s2619_s1 + $0x1c0] sm:$0xf]  ;;  %v1185_v47 = vld [vmem:[%s2619_s1 + $0x30] sm:$0xf] }
   0xb   :  { %660 = vmatpush.bf16.msra.mxu1 %v1274_v25  ;;  %v1723_v41 = vld [vmem:[%s2619_s1 + $0x1c4] sm:$0xf0]  ;;  %v1257_v42 = vld [vmem:[%s2619_s1 + $0xc0] sm:$0xf]  ;;  %v1322_v45 = vor.u32 %v1707_v39, %v1321_v37  ;;  %v1673_v48 = vld [vmem:[%s2619_s1 + $0x34] sm:$0xf0] }
   0xc   :  { %v1691_v43 = vld [vmem:[%s2619_s1 + $0xc4] sm:$0xf0]  ;;  %648 = vmatpush.bf16.msra.mxu0 %v1202_v29  ;;  %v1386_v46 = vor.u32 %v1723_v41, %v1385_v40  ;;  %v1313_v49 = vld [vmem:[%s2619_s1 + $0x130] sm:$0xf]  ;;  %v1705_v51 = vld [vmem:[%s2619_s1 + $0x134] sm:$0xf0]  ;;  %v1186_v56 = vor.u32 %v1673_v48, %v1185_v47 }
   0xd   :  { %674 = vmatpush.bf16.msra.mxu2 %v1330_v33  ;;  %v1258_v50 = vor.u32 %v1691_v43, %v1257_v42  ;;  %v1377_v52 = vld [vmem:[%s2619_s1 + $0x1b0] sm:$0xf]  ;;  %v1721_v53 = vld [vmem:[%s2619_s1 + $0x1b4] sm:$0xf0]  ;;  %v1314_v57 = vor.u32 %v1705_v51, %v1313_v49  ;;  %v1177_v59 = vld [vmem:[%s2619_s1 + $0x20] sm:$0xf] }
   0xe   :  { %687 = vmatpush.bf16.msra.mxu3 %v1394_v34  ;;  %v1249_v54 = vld [vmem:[%s2619_s1 + $0xb0] sm:$0xf]  ;;  %v1689_v55 = vld [vmem:[%s2619_s1 + $0xb4] sm:$0xf0]  ;;  %v1378_v58 = vor.u32 %v1721_v53, %v1377_v52  ;;  %v1671_v60 = vld [vmem:[%s2619_s1 + $0x24] sm:$0xf0] }
   0xf   :  { %661 = vmatpush.bf16.msra.mxu1 %v1266_v38  ;;  %v1305_v61 = vld [vmem:[%s2619_s1 + $0x120] sm:$0xf]  ;;  %v1250_v62 = vor.u32 %v1689_v55, %v1249_v54  ;;  %v1703_v63 = vld [vmem:[%s2619_s1 + $0x124] sm:$0xf0]  ;;  %v1178_v4 = vor.u32 %v1671_v60, %v1177_v59  ;;  %v1169_v7 = vld [vmem:[%s2619_s1 + $0x10] sm:$0xf] }
  0x10   :  { %649 = vmatpush.bf16.msra.mxu0 %v1194_v44  ;;  %v1369_v0 = vld [vmem:[%s2619_s1 + $0x1a0] sm:$0xf]  ;;  %v1719_v1 = vld [vmem:[%s2619_s1 + $0x1a4] sm:$0xf0]  ;;  %v1306_v5 = vor.u32 %v1703_v63, %v1305_v61  ;;  %v1669_v8 = vld [vmem:[%s2619_s1 + $0x14] sm:$0xf0] }
  0x11   :  { %675 = vmatpush.bf16.msra.mxu2 %v1322_v45  ;;  %v1241_v2 = vld [vmem:[%s2619_s1 + $0xa0] sm:$0xf]  ;;  %v1687_v3 = vld [vmem:[%s2619_s1 + $0xa4] sm:$0xf0]  ;;  %v1370_v6 = vor.u32 %v1719_v1, %v1369_v0  ;;  %v1297_v9 = vld [vmem:[%s2619_s1 + $0x110] sm:$0xf]  ;;  %v1170_v16 = vor.u32 %v1669_v8, %v1169_v7 }
  0x12   :  { %688 = vmatpush.bf16.msra.mxu3 %v1386_v46  ;;  %v1242_v10 = vor.u32 %v1687_v3, %v1241_v2  ;;  %v1701_v11 = vld [vmem:[%s2619_s1 + $0x114] sm:$0xf0]  ;;  %v1361_v12 = vld [vmem:[%s2619_s1 + $0x190] sm:$0xf]  ;;  %v1161_v17 = vld [vmem:[%s2619_s1] sm:$0xf] }
  0x13   :  { %662 = vmatpush.bf16.msra.mxu1 %v1258_v50  ;;  %v1717_v13 = vld [vmem:[%s2619_s1 + $0x194] sm:$0xf0]  ;;  %v1233_v14 = vld [vmem:[%s2619_s1 + $0x90] sm:$0xf]  ;;  %v1667_v18 = vld [vmem:[%s2619_s1 + $0x4] sm:$0xf0]  ;;  %v1298_v20 = vor.u32 %v1701_v11, %v1297_v9 }
  0x14   :  { %650 = vmatpush.bf16.msra.mxu0 %v1186_v56  ;;  %v1685_v15 = vld [vmem:[%s2619_s1 + $0x94] sm:$0xf0]  ;;  %v1289_v19 = vld [vmem:[%s2619_s1 + $0x100] sm:$0xf]  ;;  %v1362_v21 = vor.u32 %v1717_v13, %v1361_v12  ;;  %v1699_v22 = vld [vmem:[%s2619_s1 + $0x104] sm:$0xf0]  ;;  %v1162_v32 = vor.u32 %v1667_v18, %v1161_v17 }
  0x15   :  { %676 = vmatpush.bf16.msra.mxu2 %v1314_v57  ;;  %v1353_v23 = vld [vmem:[%s2619_s1 + $0x180] sm:$0xf]  ;;  %v1715_v24 = vld [vmem:[%s2619_s1 + $0x184] sm:$0xf0]  ;;  %v1234_v25 = vor.u32 %v1685_v15, %v1233_v14  ;;  %v1473_v26 = vld [vmem:[%s2619_s1 + $0x270] sm:$0xf]  ;;  %v1290_v36 = vor.u32 %v1699_v22, %v1289_v19 }
  0x16   :  { %689 = vmatpush.bf16.msra.mxu3 %v1378_v58  ;;  %v1745_v27 = vld [vmem:[%s2619_s1 + $0x274] sm:$0xf0]  ;;  %v1680_v28 = vld [vmem:[%s2619_s1 + $0x74] sm:$0xf]  ;;  %v1219_v29 = vld [vmem:[%s2619_s1 + $0x78] sm:$0xf0]  ;;  %v1354_v37 = vor.u32 %v1715_v24, %v1353_v23 }
  0x17   :  { %663 = vmatpush.bf16.msra.mxu1 %v1250_v62  ;;  %v1225_v30 = vld [vmem:[%s2619_s1 + $0x80] sm:$0xf]  ;;  %v1683_v31 = vld [vmem:[%s2619_s1 + $0x84] sm:$0xf0]  ;;  %v36_v33 = vld [vmem:[%s2618_s0 + $0x10] sm:$0xff]  ;;  %v1474_v41 = vor.u32 %v1745_v27, %v1473_v26  ;;  %v1222_v42 = vor.u32 %v1680_v28, %v1219_v29 }
  0x18   :  { %651 = vmatpush.bf16.msra.mxu0 %v1178_v4  ;;  %v1545_v34 = vld [vmem:[%s2619_s1 + $0x300] sm:$0xf]  ;;  %v1763_v35 = vld [vmem:[%s2619_s1 + $0x304] sm:$0xf0]  ;;  %v1537_v38 = vld [vmem:[%s2619_s1 + $0x2f0] sm:$0xf]  ;;  %v1226_v46 = vor.u32 %v1683_v31, %v1225_v30  ;;  %v2117_v51 = vpack.c.bf16 %v36_v33, %v36_v33 }
  0x19   :  { %677 = vmatpush.bf16.msra.mxu2 %v1306_v5  ;;  %v1761_v39 = vld [vmem:[%s2619_s1 + $0x2f4] sm:$0xf0]  ;;  %v1696_v40 = vld [vmem:[%s2619_s1 + $0xf4] sm:$0xf]  ;;  %v1283_v43 = vld [vmem:[%s2619_s1 + $0xf8] sm:$0xf0]  ;;  %v1546_v47 = vor.u32 %v1763_v35, %v1545_v34 }
  0x1a   :  { %690 = vmatpush.bf16.msra.mxu3 %v1370_v6  ;;  %v1465_v44 = vld [vmem:[%s2619_s1 + $0x260] sm:$0xf]  ;;  %v1743_v48 = vld [vmem:[%s2619_s1 + $0x264] sm:$0xf0]  ;;  %v1678_v49 = vld [vmem:[%s2619_s1 + $0x64] sm:$0xf]  ;;  %v1538_v52 = vor.u32 %v1761_v39, %v1537_v38  ;;  %v1286_v55 = vor.u32 %v1696_v40, %v1283_v43 }
  0x1b   :  { %664 = vmatpush.bf16.msra.mxu1 %v1242_v10  ;;  %v34_v45 = vld [vmem:[%s2618_s0] sm:$0xff]  ;;  %v1211_v50 = vld [vmem:[%s2619_s1 + $0x68] sm:$0xf0]  ;;  %v37_v53 = vld [vmem:[%s2618_s0 + $0x18] sm:$0xff]  ;;  %v1466_v59 = vor.u32 %v1743_v48, %v1465_v44 }
  0x1c   :  { %652 = vmatpush.bf16.msra.mxu0 %v1170_v16  ;;  %v35_v54 = vld [vmem:[%s2618_s0 + $0x8] sm:$0xff]  ;;  %v1529_v56 = vld [vmem:[%s2619_s1 + $0x2e0] sm:$0xf]  ;;  %v2131_v58 = vpack.c.bf16 %v34_v45, %v34_v45  ;;  %v1214_v60 = vor.u32 %v1678_v49, %v1211_v50  ;;  %v1694_v61 = vld [vmem:[%s2619_s1 + $0xe4] sm:$0xf]  ;;  %v2151_v3 = vpack.c.bf16 %v37_v53, %v37_v53 }
  0x1d   :  { %678 = vmatpush.bf16.msra.mxu2 %v1298_v20  ;;  %v1759_v57 = vld [vmem:[%s2619_s1 + $0x2e4] sm:$0xf0]  ;;  %v1275_v62 = vld [vmem:[%s2619_s1 + $0xe8] sm:$0xf0]  ;;  %v1457_v63 = vld [vmem:[%s2619_s1 + $0x250] sm:$0xf]  ;;  %v2153_v4 = vpack.c.bf16 %v35_v54, %v35_v54 }
  0x1e   :  { %691 = vmatpush.bf16.msra.mxu3 %v1362_v21  ;;  %v1741_v0 = vld [vmem:[%s2619_s1 + $0x254] sm:$0xf0]  ;;  %v1676_v1 = vld [vmem:[%s2619_s1 + $0x54] sm:$0xf]  ;;  %v1203_v2 = vld [vmem:[%s2619_s1 + $0x58] sm:$0xf0]  ;;  %v1530_v5 = vor.u32 %v1759_v57, %v1529_v56  ;;  %v1278_v6 = vor.u32 %v1694_v61, %v1275_v62 }
  0x1f   :  { %665 = vmatpush.bf16.msra.mxu1 %v1234_v25  ;;  %v1521_v7 = vld [vmem:[%s2619_s1 + $0x2d0] sm:$0xf]  ;;  %v1757_v8 = vld [vmem:[%s2619_s1 + $0x2d4] sm:$0xf0]  ;;  %v1458_v9 = vor.u32 %v1741_v0, %v1457_v63  ;;  %v1206_v10 = vor.u32 %v1676_v1, %v1203_v2  ;;  %v1692_v11 = vld [vmem:[%s2619_s1 + $0xd4] sm:$0xf] }
  0x20   :  { %653 = vmatpush.bf16.msra.mxu0 %v1162_v32  ;;  %v1267_v12 = vld [vmem:[%s2619_s1 + $0xd8] sm:$0xf0]  ;;  %v1449_v13 = vld [vmem:[%s2619_s1 + $0x240] sm:$0xf]  ;;  %v1739_v14 = vld [vmem:[%s2619_s1 + $0x244] sm:$0xf0]  ;;  %v1522_v17 = vor.u32 %v1757_v8, %v1521_v7 }
  0x21   :  { %679 = vmatpush.bf16.msra.mxu2 %v1290_v36  ;;  %v1674_v15 = vld [vmem:[%s2619_s1 + $0x44] sm:$0xf]  ;;  %v1195_v16 = vld [vmem:[%s2619_s1 + $0x48] sm:$0xf0]  ;;  %v1270_v18 = vor.u32 %v1692_v11, %v1267_v12  ;;  %v1513_v19 = vld [vmem:[%s2619_s1 + $0x2c0] sm:$0xf]  ;;  %v1450_v21 = vor.u32 %v1739_v14, %v1449_v13 }
  0x22   :  { %692 = vmatpush.bf16.msra.mxu3 %v1354_v37  ;;  %v1755_v20 = vld [vmem:[%s2619_s1 + $0x2c4] sm:$0xf0]  ;;  %v1198_v22 = vor.u32 %v1674_v15, %v1195_v16  ;;  %v1690_v23 = vld [vmem:[%s2619_s1 + $0xc4] sm:$0xf]  ;;  %v1259_v24 = vld [vmem:[%s2619_s1 + $0xc8] sm:$0xf0] }
  0x23   :  { %666 = vmatpush.bf16.msra.mxu1 %v1226_v46  ;;  %654 = vmatmul.bf16.vlgmr.msra.gmra.mxu0 %v2131_v58  ;;  %v1441_v25 = vld [vmem:[%s2619_s1 + $0x230] sm:$0xf]  ;;  %v1737_v26 = vld [vmem:[%s2619_s1 + $0x234] sm:$0xf0]  ;;  %v1672_v27 = vld [vmem:[%s2619_s1 + $0x34] sm:$0xf]  ;;  %v1514_v29 = vor.u32 %v1755_v20, %v1513_v19  ;;  %v1262_v30 = vor.u32 %v1690_v23, %v1259_v24 }
  0x24   :  { %698 = vmatpush.bf16.msrb.mxu0 %v1474_v41  ;;  %680 = vmatmul.bf16.vlgmr.msra.gmra.mxu2 %v2117_v51  ;;  %v1187_v28 = vld [vmem:[%s2619_s1 + $0x38] sm:$0xf0]  ;;  %v1505_v31 = vld [vmem:[%s2619_s1 + $0x2b0] sm:$0xf]  ;;  %v1753_v32 = vld [vmem:[%s2619_s1 + $0x2b4] sm:$0xf0]  ;;  %v1442_v34 = vor.u32 %v1737_v26, %v1441_v25 }
  0x25   :  { %731 = vmatpush.bf16.msrb.mxu2 %v1546_v47  ;;  %693 = vmatmul.bf16.vlgmr.msra.gmra.mxu3 %v2151_v3  ;;  %v40_v33 = vld [vmem:[%s2618_s0 + $0x30] sm:$0xff]  ;;  %v1190_v35 = vor.u32 %v1672_v27, %v1187_v28  ;;  %v1251_v37 = vld [vmem:[%s2619_s1 + $0xb8] sm:$0xf0]  ;;  %v1433_v38 = vld [vmem:[%s2619_s1 + $0x220] sm:$0xf] }
  0x26   :  { %737 = vmatpush.bf16.msrb.mxu3 %v1222_v42  ;;  %667 = vmatmul.bf16.vlgmr.msra.gmra.mxu1 %v2153_v4  ;;  %v1688_v36 = vld [vmem:[%s2619_s1 + $0xb4] sm:$0xf]  ;;  %v1735_v39 = vld [vmem:[%s2619_s1 + $0x224] sm:$0xf0]  ;;  %v1670_v40 = vld [vmem:[%s2619_s1 + $0x24] sm:$0xf]  ;;  %v1506_v42 = vor.u32 %v1753_v32, %v1505_v31  ;;  %v2234_v43 = vpack.c.bf16 %v40_v33, %v40_v33 }
  0x27   :  { %711 = vmatpush.bf16.msrb.mxu1 %v1538_v52  ;;  %v1179_v41 = vld [vmem:[%s2619_s1 + $0x28] sm:$0xf0]  ;;  %v1254_v44 = vor.u32 %v1688_v36, %v1251_v37  ;;  %v1497_v45 = vld [vmem:[%s2619_s1 + $0x2a0] sm:$0xf]  ;;  %v1751_v46 = vld [vmem:[%s2619_s1 + $0x2a4] sm:$0xf0]  ;;  %v1434_v47 = vor.u32 %v1735_v39, %v1433_v38 }
  0x28   :  { %699 = vmatpush.bf16.msrb.mxu0 %v1466_v59  ;;  %v1182_v48 = vor.u32 %v1670_v40, %v1179_v41  ;;  %v1686_v49 = vld [vmem:[%s2619_s1 + $0xa4] sm:$0xf]  ;;  %v1243_v50 = vld [vmem:[%s2619_s1 + $0xa8] sm:$0xf0]  ;;  %v1425_v52 = vld [vmem:[%s2619_s1 + $0x210] sm:$0xf]  ;;  %v1498_v56 = vor.u32 %v1751_v46, %v1497_v45 }
  0x29   :  { %750 = vmatpush.bf16.msra.mxu2 %v1286_v55  ;;  %v1733_v53 = vld [vmem:[%s2619_s1 + $0x214] sm:$0xf0]  ;;  %v1668_v54 = vld [vmem:[%s2619_s1 + $0x14] sm:$0xf]  ;;  %v1171_v55 = vld [vmem:[%s2619_s1 + $0x18] sm:$0xf0]  ;;  %v1246_v57 = vor.u32 %v1686_v49, %v1243_v50 }
  0x2a   :  { %738 = vmatpush.bf16.msrb.mxu3 %v1214_v60  ;;  %v1489_v59 = vld [vmem:[%s2619_s1 + $0x290] sm:$0xf]  ;;  %v1749_v60 = vld [vmem:[%s2619_s1 + $0x294] sm:$0xf0]  ;;  %v1684_v61 = vld [vmem:[%s2619_s1 + $0x94] sm:$0xf]  ;;  %v1426_v62 = vor.u32 %v1733_v53, %v1425_v52  ;;  %v1174_v63 = vor.u32 %v1668_v54, %v1171_v55 }
  0x2b   :  { %712 = vmatpush.bf16.msrb.mxu1 %v1530_v5  ;;  %v1235_v0 = vld [vmem:[%s2619_s1 + $0x98] sm:$0xf0]  ;;  %v1417_v1 = vld [vmem:[%s2619_s1 + $0x200] sm:$0xf]  ;;  %v1731_v2 = vld [vmem:[%s2619_s1 + $0x204] sm:$0xf0]  ;;  %v1490_v8 = vor.u32 %v1749_v60, %v1489_v59 }
  0x2c   :  { %700 = vmatpush.bf16.msrb.mxu0 %v1458_v9  ;;  %v1666_v5 = vld [vmem:[%s2619_s1 + $0x4] sm:$0xf]  ;;  %v1712_v7 = vld [vmem:[%s2619_s1 + $0x174] sm:$0xf]  ;;  %v1347_v9 = vld [vmem:[%s2619_s1 + $0x178] sm:$0xf0]  ;;  %v1238_v12 = vor.u32 %v1684_v61, %v1235_v0  ;;  %v1418_v16 = vor.u32 %v1731_v2, %v1417_v1 }
  0x2d   :  { %751 = vmatpush.bf16.msra.mxu2 %v1278_v6  ;;  %v1163_v6 = vld [vmem:[%s2619_s1 + $0x8] sm:$0xf0]  ;;  %v1475_v11 = vld [vmem:[%s2619_s1 + $0x278] sm:$0xf0]  ;;  %v1481_v13 = vld [vmem:[%s2619_s1 + $0x280] sm:$0xf] }
  0x2e   :  { %739 = vmatpush.bf16.msrb.mxu3 %v1206_v10  ;;  %v1744_v10 = vld [vmem:[%s2619_s1 + $0x274] sm:$0xf]  ;;  %v1747_v14 = vld [vmem:[%s2619_s1 + $0x284] sm:$0xf0]  ;;  %v38_v15 = vld [vmem:[%s2618_s0 + $0x20] sm:$0xff] }
  0x2f   :  { %713 = vmatpush.bf16.msrb.mxu1 %v1522_v17  ;;  %v1166_v17 = vor.u32 %v1666_v5, %v1163_v6  ;;  %v1227_v19 = vld [vmem:[%s2619_s1 + $0x88] sm:$0xf0]  ;;  %v1728_v20 = vld [vmem:[%s2619_s1 + $0x1f4] sm:$0xf]  ;;  %v1411_v23 = vld [vmem:[%s2619_s1 + $0x1f8] sm:$0xf0]  ;;  %v1482_v26 = vor.u32 %v1747_v14, %v1481_v13 }
  0x30   :  { %701 = vmatpush.bf16.msrb.mxu0 %v1450_v21  ;;  %v1350_v21 = vor.u32 %v1712_v7, %v1347_v9  ;;  %v1760_v24 = vld [vmem:[%s2619_s1 + $0x2f4] sm:$0xf]  ;;  %v1539_v25 = vld [vmem:[%s2619_s1 + $0x2f8] sm:$0xf0]  ;;  %v39_v27 = vld [vmem:[%s2618_s0 + $0x28] sm:$0xff] }
  0x31   :  { %752 = vmatpush.bf16.msra.mxu2 %v1270_v18  ;;  %v1682_v18 = vld [vmem:[%s2619_s1 + $0x84] sm:$0xf]  ;;  %v1467_v33 = vld [vmem:[%s2619_s1 + $0x268] sm:$0xf0]  ;;  %v2345_v37 = vpack.c.bf16 %v39_v27, %v39_v27  ;;  %v1331_v45 = vld [vmem:[%s2619_s1 + $0x158] sm:$0xf0] }
  0x32   :  { %740 = vmatpush.bf16.msrb.mxu3 %v1198_v22  ;;  %v1478_v22 = vor.u32 %v1744_v10, %v1475_v11  ;;  %v1710_v28 = vld [vmem:[%s2619_s1 + $0x164] sm:$0xf]  ;;  %v1230_v31 = vor.u32 %v1682_v18, %v1227_v19  ;;  %v1403_v39 = vld [vmem:[%s2619_s1 + $0x1e8] sm:$0xf0]  ;;  %v1740_v46 = vld [vmem:[%s2619_s1 + $0x254] sm:$0xf] }
  0x33   :  { %714 = vmatpush.bf16.msrb.mxu1 %v1514_v29  ;;  %v1339_v29 = vld [vmem:[%s2619_s1 + $0x168] sm:$0xf0]  ;;  %v1742_v32 = vld [vmem:[%s2619_s1 + $0x264] sm:$0xf]  ;;  %v1724_v50 = vld [vmem:[%s2619_s1 + $0x1d4] sm:$0xf] }
  0x34   :  { %702 = vmatpush.bf16.msrb.mxu0 %v1442_v34  ;;  %1551 = vmatmul.msk.bf16.vlgmr.msrb.gmra.mxu2 %vm642_vm0, %v2234_v43  ;;  %v1414_v34 = vor.u32 %v1728_v20, %v1411_v23  ;;  %v1726_v36 = vld [vmem:[%s2619_s1 + $0x1e4] sm:$0xf]  ;;  %v1342_v38 = vor.u32 %v1710_v28, %v1339_v29  ;;  %v1531_v41 = vld [vmem:[%s2619_s1 + $0x2e8] sm:$0xf0]  ;;  %v1395_v52 = vld [vmem:[%s2619_s1 + $0x1d8] sm:$0xf0] }
  0x35   :  { %753 = vmatpush.bf16.msra.mxu2 %v1262_v30  ;;  %v2334_v30 = vpack.c.bf16 %v38_v15, %v38_v15  ;;  %v1758_v40 = vld [vmem:[%s2619_s1 + $0x2e4] sm:$0xf]  ;;  %v1756_v53 = vld [vmem:[%s2619_s1 + $0x2d4] sm:$0xf]  ;;  %v1523_v55 = vld [vmem:[%s2619_s1 + $0x2d8] sm:$0xf0] }
  0x36   :  { %741 = vmatpush.bf16.msrb.mxu3 %v1190_v35  ;;  %v1542_v35 = vor.u32 %v1760_v24, %v1539_v25  ;;  %v1534_v49 = vor.u32 %v1758_v40, %v1531_v41  ;;  %v1738_v60 = vld [vmem:[%s2619_s1 + $0x244] sm:$0xf]  ;;  %v1451_v61 = vld [vmem:[%s2619_s1 + $0x248] sm:$0xf0] }
  0x37   :  { %715 = vmatpush.bf16.msrb.mxu1 %v1506_v42  ;;  %v1470_v42 = vor.u32 %v1742_v32, %v1467_v33 }
  0x38   :  { %703 = vmatpush.bf16.msrb.mxu0 %v1434_v47  ;;  %v1459_v47 = vld [vmem:[%s2619_s1 + $0x258] sm:$0xf0] }
  0x39   :  { %754 = vmatpush.bf16.msra.mxu2 %v1254_v44  ;;  %v1708_v44 = vld [vmem:[%s2619_s1 + $0x154] sm:$0xf]  ;;  %v1462_v59 = vor.u32 %v1740_v46, %v1459_v47 }
  0x3a   :  { %742 = vmatpush.bf16.msrb.mxu3 %v1182_v48  ;;  %v1406_v48 = vor.u32 %v1726_v36, %v1403_v39  ;;  %v1334_v54 = vor.u32 %v1708_v44, %v1331_v45 }
  0x3b   :  { %716 = vmatpush.bf16.msrb.mxu1 %v1498_v56  ;;  %v1706_v56 = vld [vmem:[%s2619_s1 + $0x144] sm:$0xf] }
  0x3c   :  { %704 = vmatpush.bf16.msrb.mxu0 %v1426_v62 }
  0x3d   :  { %755 = vmatpush.bf16.msra.mxu2 %v1246_v57  ;;  %v1323_v57 = vld [vmem:[%s2619_s1 + $0x148] sm:$0xf0] }
  0x3e   :  { %743 = vmatpush.bf16.msrb.mxu3 %v1174_v63 }
  0x3f   :  { %717 = vmatpush.bf16.msrb.mxu1 %v1490_v8 }
  0x40   :  { %705 = vmatpush.bf16.msrb.mxu0 %v1418_v16 }
  0x41   :  { %756 = vmatpush.bf16.msra.mxu2 %v1238_v12 }
  0x42   :  { %744 = vmatpush.bf16.msrb.mxu3 %v1166_v17 }
  0x43   :  { %718 = vmatpush.bf16.msrb.mxu1 %v1482_v26  ;;  %706 = vmatmul.bf16.vlgmr.msrb.gmra.mxu0 %v2334_v30 }
  0x44   :  { %763 = vmatpush.bf16.msra.mxu0 %v1350_v21 }
  0x45   :  { %757 = vmatpush.bf16.msra.mxu2 %v1230_v31  ;;  %745 = vmatmul.bf16.vlgmr.msrb.gmra.mxu3 %v2131_v58 }
  0x46   :  { %789 = vmatpush.bf16.msra.mxu3 %v1478_v22  ;;  %719 = vmatmul.bf16.vlgmr.msrb.gmra.mxu1 %v2345_v37 }
  0x47   :  { %776 = vmatpush.bf16.msra.mxu1 %v1414_v34 }
  0x48   :  { %764 = vmatpush.bf16.msra.mxu0 %v1342_v38  ;;  %758 = vmatmul.bf16.vlgmr.msra.gmra.mxu2 %v2153_v4 }
  0x49   :  { %802 = vmatpush.bf16.msrb.mxu2 %v1542_v35 }
  0x4a   :  { %790 = vmatpush.bf16.msra.mxu3 %v1470_v42 }
  0x4b   :  { %14 = vsyncpa [#allocation3], 0  ;;  %777 = vmatpush.bf16.msra.mxu1 %v1406_v48  ;;  %v1398_v62 = vor.u32 %v1724_v50, %v1395_v52  ;;  %v1526_v63 = vor.u32 %v1756_v53, %v1523_v55  ;;  %v1722_v0 = vld [vmem:[%s2619_s1 + $0x1c4] sm:$0xf]  ;;  %v1326_v1 = vor.u32 %v1706_v56, %v1323_v57  ;;  %v1387_v2 = vld [vmem:[%s2619_s1 + $0x1c8] sm:$0xf0]  ;;  %v1454_v5 = vor.u32 %v1738_v60, %v1451_v61 }
  0x4c   :  { %765 = vmatpush.bf16.msra.mxu0 %v1334_v54  ;;  %v1754_v4 = vld [vmem:[%s2619_s1 + $0x2c4] sm:$0xf]  ;;  %v1515_v58 = vld [vmem:[%s2619_s1 + $0x2c8] sm:$0xf0]  ;;  %v1704_v6 = vld [vmem:[%s2619_s1 + $0x134] sm:$0xf]  ;;  %v1390_v10 = vor.u32 %v1722_v0, %v1387_v2 }
  0x4d   :  { %803 = vmatpush.bf16.msrb.mxu2 %v1534_v49  ;;  %v1315_v7 = vld [vmem:[%s2619_s1 + $0x138] sm:$0xf0]  ;;  %v1736_v8 = vld [vmem:[%s2619_s1 + $0x234] sm:$0xf]  ;;  %v1518_v11 = vor.u32 %v1754_v4, %v1515_v58  ;;  %v1702_v18 = vld [vmem:[%s2619_s1 + $0x124] sm:$0xf] }
  0x4e   :  { %791 = vmatpush.bf16.msra.mxu3 %v1462_v59  ;;  %v1443_v9 = vld [vmem:[%s2619_s1 + $0x238] sm:$0xf0]  ;;  %v1720_v12 = vld [vmem:[%s2619_s1 + $0x1b4] sm:$0xf]  ;;  %v1318_v13 = vor.u32 %v1704_v6, %v1315_v7  ;;  %v1307_v19 = vld [vmem:[%s2619_s1 + $0x128] sm:$0xf0] }
  0x4f   :  { %778 = vmatpush.bf16.msra.mxu1 %v1398_v62  ;;  %v1379_v14 = vld [vmem:[%s2619_s1 + $0x1b8] sm:$0xf0]  ;;  %v1752_v15 = vld [vmem:[%s2619_s1 + $0x2b4] sm:$0xf]  ;;  %v1446_v17 = vor.u32 %v1736_v8, %v1443_v9  ;;  %v1734_v20 = vld [vmem:[%s2619_s1 + $0x224] sm:$0xf]  ;;  %v1310_v25 = vor.u32 %v1702_v18, %v1307_v19 }
  0x50   :  { %766 = vmatpush.bf16.msra.mxu0 %v1326_v1  ;;  %v1507_v16 = vld [vmem:[%s2619_s1 + $0x2b8] sm:$0xf0]  ;;  %v1435_v21 = vld [vmem:[%s2619_s1 + $0x228] sm:$0xf0]  ;;  %v1382_v22 = vor.u32 %v1720_v12, %v1379_v14  ;;  %v1718_v24 = vld [vmem:[%s2619_s1 + $0x1a4] sm:$0xf] }
  0x51   :  { %804 = vmatpush.bf16.msrb.mxu2 %v1526_v63  ;;  %v1510_v23 = vor.u32 %v1752_v15, %v1507_v16  ;;  %v1371_v26 = vld [vmem:[%s2619_s1 + $0x1a8] sm:$0xf0]  ;;  %v1750_v27 = vld [vmem:[%s2619_s1 + $0x2a4] sm:$0xf]  ;;  %v1438_v29 = vor.u32 %v1734_v20, %v1435_v21  ;;  %v1700_v31 = vld [vmem:[%s2619_s1 + $0x114] sm:$0xf] }
  0x52   :  { %792 = vmatpush.bf16.msra.mxu3 %v1454_v5  ;;  %v1499_v28 = vld [vmem:[%s2619_s1 + $0x2a8] sm:$0xf0]  ;;  %v1299_v32 = vld [vmem:[%s2619_s1 + $0x118] sm:$0xf0]  ;;  %v1732_v33 = vld [vmem:[%s2619_s1 + $0x214] sm:$0xf]  ;;  %v1374_v35 = vor.u32 %v1718_v24, %v1371_v26 }
  0x53   :  { %779 = vmatpush.bf16.msra.mxu1 %v1390_v10  ;;  %v1427_v34 = vld [vmem:[%s2619_s1 + $0x218] sm:$0xf0]  ;;  %v1502_v36 = vor.u32 %v1750_v27, %v1499_v28  ;;  %v1716_v38 = vld [vmem:[%s2619_s1 + $0x194] sm:$0xf]  ;;  %v1302_v39 = vor.u32 %v1700_v31, %v1299_v32  ;;  %v1698_v45 = vld [vmem:[%s2619_s1 + $0x104] sm:$0xf] }
  0x54   :  { %767 = vmatpush.bf16.msra.mxu0 %v1318_v13  ;;  %v1363_v40 = vld [vmem:[%s2619_s1 + $0x198] sm:$0xf0]  ;;  %v1748_v41 = vld [vmem:[%s2619_s1 + $0x294] sm:$0xf]  ;;  %v1430_v44 = vor.u32 %v1732_v33, %v1427_v34  ;;  %v1291_v46 = vld [vmem:[%s2619_s1 + $0x108] sm:$0xf0] }
  0x55   :  { %805 = vmatpush.bf16.msrb.mxu2 %v1518_v11  ;;  %v1491_v42 = vld [vmem:[%s2619_s1 + $0x298] sm:$0xf0]  ;;  %v1730_v47 = vld [vmem:[%s2619_s1 + $0x204] sm:$0xf]  ;;  %v1419_v48 = vld [vmem:[%s2619_s1 + $0x208] sm:$0xf0]  ;;  %v1366_v52 = vor.u32 %v1716_v38, %v1363_v40  ;;  %v1294_v54 = vor.u32 %v1698_v45, %v1291_v46 }
  0x56   :  { %793 = vmatpush.bf16.msra.mxu3 %v1446_v17  ;;  %v1762_v49 = vld [vmem:[%s2619_s1 + $0x304] sm:$0xf]  ;;  %v1547_v50 = vld [vmem:[%s2619_s1 + $0x308] sm:$0xf0]  ;;  %v1494_v53 = vor.u32 %v1748_v41, %v1491_v42  ;;  %v1422_v57 = vor.u32 %v1730_v47, %v1419_v48  ;;  %v1771_v0 = vld [vmem:[%s2621_s3 + $0x38] sm:$0xff]  ;;  %vm1111_vm1 = vcmask 523264  }
  0x57   :  { %780 = vmatpush.bf16.msra.mxu1 %v1382_v22  ;;  %v1714_v55 = vld [vmem:[%s2619_s1 + $0x184] sm:$0xf]  ;;  %v1355_v56 = vld [vmem:[%s2619_s1 + $0x188] sm:$0xf0]  ;;  %v1550_v61 = vor.u32 %v1762_v49, %v1547_v50  ;;  %v1770_v1 = vld [vmem:[%s2621_s3 + $0x30] sm:$0xff]  ;;  %vm1129_vm2 = vcmask 80896  }
  0x58   :  { %768 = vmatpush.bf16.msra.mxu0 %v1310_v25  ;;  %v1746_v59 = vld [vmem:[%s2619_s1 + $0x284] sm:$0xf]  ;;  %v1483_v60 = vld [vmem:[%s2619_s1 + $0x288] sm:$0xf0]  ;;  %v1358_v62 = vor.u32 %v1714_v55, %v1355_v56  ;;  %v146_v6 = vld [vmem:[%s2620_s2] sm:$0x3] }
  0x59   :  { %806 = vmatpush.bf16.msrb.mxu2 %v1510_v23  ;;  %v1486_v63 = vor.u32 %v1746_v59, %v1483_v60  ;;  %v1764_v58 = vld [vmem:[%s2621_s3] sm:$0xff]  ;;  %v1779_v9 = vld [vmem:[%s2621_s3 + $0x78] sm:$0xff]  ;;  %v148_v11 = vperm.slane %v146_v6, 0  ;;  %v1778_v13 = vld [vmem:[%s2621_s3 + $0x70] sm:$0xff]  ;;  %v149_v42 = vperm.slane %v146_v6, 1  ;;  %s1150_s22 = sshll.u32 %s2627_s9, 4  ;;  %s1151_s22 = int_to_ptr.hbm [resolvable:$true] %s1150_s22 }
  0x5a   :  { %794 = vmatpush.bf16.msra.mxu3 %v1438_v29  ;;  %v1777_v19 = vld [vmem:[%s2621_s3 + $0x68] sm:$0xff]  ;;  %v1776_v22 = vld [vmem:[%s2621_s3 + $0x60] sm:$0xff]  ;;  %v1775_v27 = vld [vmem:[%s2621_s3 + $0x58] sm:$0xff] }
  0x5b   :  { %781 = vmatpush.bf16.msra.mxu1 %v1374_v35  ;;  %v1774_v32 = vld [vmem:[%s2621_s3 + $0x50] sm:$0xff]  ;;  %v1773_v38 = vld [vmem:[%s2621_s3 + $0x48] sm:$0xff]  ;;  %v1791_v6 = vld [vmem:[%s2625_s7 + $0x18] sm:$0xff] }
  0x5c   :  { %769 = vmatpush.bf16.msra.mxu0 %v1302_v39  ;;  %v1772_v39 = vld [vmem:[%s2621_s3 + $0x40] sm:$0xff] }
  0x5d   :  { %807 = vmatpush.bf16.msrb.mxu2 %v1502_v36 }
  0x5e   :  { %795 = vmatpush.bf16.msra.mxu3 %v1430_v44 }
  0x5f   :  { %782 = vmatpush.bf16.msra.mxu1 %v1366_v52 }
  0x60   :  { %770 = vmatpush.bf16.msra.mxu0 %v1294_v54 }
  0x61   :  { %808 = vmatpush.bf16.msrb.mxu2 %v1494_v53 }
  0x62   :  { %796 = vmatpush.bf16.msra.mxu3 %v1422_v57 }
  0x63   :  { %783 = vmatpush.bf16.msra.mxu1 %v1358_v62  ;;  %771 = vmatmul.bf16.vlgmr.msra.gmra.mxu0 %v2117_v51  ;;  %v1769_v51 = vld [vmem:[%s2621_s3 + $0x28] sm:$0xff] }
  0x64   :  { %822 = vmatpush.bf16.msrb.mxu0 %v1550_v61 }
  0x65   :  { %797 = vmatmul.bf16.vlgmr.msra.gmra.mxu3 %v2334_v30  ;;  %809 = vmatpush.bf16.msrb.mxu2 %v1486_v63  ;;  %v1766_v30 = vld [vmem:[%s2621_s3 + $0x10] sm:$0xff] }
  0x66   :  { %784 = vmatmul.bf16.vlgmr.msra.gmra.mxu1 %v2151_v3  ;;  %v1768_v3 = vld [vmem:[%s2621_s3 + $0x20] sm:$0xff]  ;;  %977 = vmatpush.bf16.msrb.mxu3 %v1779_v9 }
  0x67   :  { %964 = vmatpush.bf16.msrb.mxu1 %v1771_v0  ;;  %v1793_v9 = vld [vmem:[%s2622_s4] ss:$0 sm:$0xff] }
  0x68   :  { %810 = vmatmul.bf16.vlgmr.msrb.gmra.mxu2 %v2345_v37  ;;  %v1765_v37 = vld [vmem:[%s2621_s3 + $0x8] sm:$0xff] }
  0x69   :  { %1119 = vmatpush.bf16.msra.mxu2 %v1791_v6 }
  0x6a   :  { %978 = vmatpush.bf16.msrb.mxu3 %v1778_v13 }
  0x6b   :  { %965 = vmatpush.bf16.msrb.mxu1 %v1770_v1  ;;  %v1787_v1 = vld [vmem:[%s2623_s5 + $0x38] sm:$0xff] }
  0x6c   :  { %1060 = vmatpush.bf16.msra.mxu0 %v1787_v1 }
  0x6e   :  { %979 = vmatpush.bf16.msrb.mxu3 %v1777_v19 }
  0x6f   :  { %966 = vmatpush.bf16.msrb.mxu1 %v1769_v51  ;;  %v1786_v51 = vld [vmem:[%s2623_s5 + $0x30] sm:$0xff] }
  0x70   :  { %1061 = vmatpush.bf16.msra.mxu0 %v1786_v51 }
  0x72   :  { %980 = vmatpush.bf16.msrb.mxu3 %v1776_v22 }
  0x73   :  { %1552 = vmatmul.msk.bf16.vlgmr.msrb.gmra.mxu0 %vm642_vm0, %v2234_v43  ;;  %967 = vmatpush.bf16.msrb.mxu1 %v1768_v3  ;;  %v1767_v43 = vld [vmem:[%s2621_s3 + $0x18] sm:$0xff]  ;;  %v1785_v3 = vld [vmem:[%s2623_s5 + $0x28] sm:$0xff] }
  0x74   :  { %1062 = vmatpush.bf16.msra.mxu0 %v1785_v3 }
  0x76   :  { %981 = vmatpush.bf16.msrb.mxu3 %v1775_v27 }
  0x77   :  { %968 = vmatpush.bf16.msrb.mxu1 %v1767_v43  ;;  %v1784_v43 = vld [vmem:[%s2623_s5 + $0x20] sm:$0xff] }
  0x78   :  { %1063 = vmatpush.bf16.msra.mxu0 %v1784_v43 }
  0x7a   :  { %982 = vmatpush.bf16.msrb.mxu3 %v1774_v32 }
  0x7b   :  { %969 = vmatpush.bf16.msrb.mxu1 %v1766_v30  ;;  %v1783_v30 = vld [vmem:[%s2623_s5 + $0x18] sm:$0xff] }
  0x7c   :  { %1064 = vmatpush.bf16.msra.mxu0 %v1783_v30 }
  0x7e   :  { %983 = vmatpush.bf16.msrb.mxu3 %v1773_v38 }
  0x7f   :  { %970 = vmatpush.bf16.msrb.mxu1 %v1765_v37  ;;  %v1782_v37 = vld [vmem:[%s2623_s5 + $0x10] sm:$0xff] }
  0x80   :  { %1065 = vmatpush.bf16.msra.mxu0 %v1782_v37 }
  0x82   :  { %984 = vmatpush.bf16.msrb.mxu3 %v1772_v39 }
  0x83   :  { %971 = vmatpush.bf16.msrb.mxu1 %v1764_v58  ;;  %v1781_v58 = vld [vmem:[%s2623_s5 + $0x8] sm:$0xff] }
  0x84   :  { %1066 = vmatpush.bf16.msra.mxu0 %v1781_v58 }
  0xa0   :  { %v655_v2 = vpop.f32.mrf.mxu0 }
  0xa1   :  { %v656_v14 = vadd.f32 %v655_v2, %v148_v11 }
  0xa3   :  { %v668_v4 = vpop.f32.mrf.mxu1 }
  0xa4   :  { %v669_v16 = vadd.f32 %v668_v4, %v656_v14 }
  0xa7   :  { %v681_v5 = vpop.f32.mrf.mxu2 }
  0xa8   :  { %v694_v7 = vpop.f32.mrf.mxu3  ;;  %v657_v8 = vpop.f32.mrf.mxu0  ;;  %v682_v18 = vadd.f32 %v681_v5, %v669_v16  ;;  %v1780_v5 = vld [vmem:[%s2623_s5] sm:$0xff] }
  0xa9   :  { %1067 = vmatpush.bf16.msra.mxu0 %v1780_v5  ;;  %v1789_v8 = vld [vmem:[%s2625_s7 + $0x8] sm:$0xff]  ;;  %v1788_v16 = vld [vmem:[%s2625_s7] sm:$0xff] }
  0xaa   :  { %v695_v20 = vadd.f32 %v694_v7, %v682_v18  ;;  %v1790_v7 = vld [vmem:[%s2625_s7 + $0x10] sm:$0xff] }
  0xab   :  { %v670_v10 = vpop.f32.mrf.mxu1  ;;  %1120 = vmatpush.bf16.msra.mxu2 %v1790_v7 }
  0xaf   :  { %v683_v12 = vpop.f32.mrf.mxu2  ;;  %1121 = vmatpush.bf16.msra.mxu2 %v1789_v8 }
  0xb0   :  { %v696_v15 = vpop.f32.mrf.mxu3 }
  0xb3   :  { %1122 = vmatpush.bf16.msra.mxu2 %v1788_v16 }
  0xb7   :  { %v733_v17 = vpop.f32.mrf.mxu2 }
  0xbf   :  { %v735_v24 = vpop.f32.mrf.mxu2 }
  0xc0   :  { %v707_v21 = vpop.f32.mrf.mxu0 }
  0xc1   :  { %v708_v23 = vadd.f32 %v707_v21, %v695_v20 }
  0xc3   :  { %v720_v25 = vpop.f32.mrf.mxu1 }
  0xc4   :  { %v721_v26 = vadd.f32 %v720_v25, %v708_v23  ;;  %v1795_v23 = vld [vmem:[%s2626_s8] ss:$0 sm:$0xff] }
  0xc6   :  { %v734_v28 = vadd.f32 %v733_v17, %v721_v26  ;;  %v1794_v17 = vld [vmem:[%s2624_s6] ss:$0 sm:$0xff]  ;;  %s1826_s6 = smov [#allocation2]  }
  0xc7   :  { %s1148_s7 = sshll.u32 %s1826_s6, 4  ;;  %s1149_s7 = int_to_ptr.vmem [resolvable:$true] %s1148_s7 }
  0xc8   :  { %v828_v29 = vmax.f32 %v734_v28, 0.0  ;;  %v709_v31 = vpop.f32.mrf.mxu0  ;;  %v746_v35 = vpop.f32.mrf.mxu3 }
  0xc9   :  { %v747_v44 = vadd.f32 %v746_v35, %v149_v42 }
  0xca   :  { %v830_v33 = vpack.c.bf16 %v828_v29, %v828_v29 }
  0xcb   :  { %v759_v34 = vpop.f32.mrf.mxu2  ;;  %v722_v36 = vpop.f32.mrf.mxu1 }
  0xcc   :  { %972 = vmatmul.bf16.vlgmr.msrb.gmra.mxu1 %v830_v33  ;;  %v760_v46 = vadd.f32 %v759_v34, %v747_v44 }
  0xd0   :  { %v748_v41 = vpop.f32.mrf.mxu3 }
  0xd3   :  { %v761_v40 = vpop.f32.mrf.mxu2 }
  0xe0   :  { %v772_v45 = vpop.f32.mrf.mxu0 }
  0xe1   :  { %v773_v48 = vadd.f32 %v772_v45, %v760_v46 }
  0xe3   :  { %v785_v47 = vpop.f32.mrf.mxu1 }
  0xe4   :  { %v786_v52 = vadd.f32 %v785_v47, %v773_v48 }
  0xe8   :  { %v798_v49 = vpop.f32.mrf.mxu3  ;;  %v774_v50 = vpop.f32.mrf.mxu0 }
  0xe9   :  { %v799_v54 = vadd.f32 %v798_v49, %v786_v52 }
  0xeb   :  { %v811_v53 = vpop.f32.mrf.mxu2  ;;  %v787_v55 = vpop.f32.mrf.mxu1 }
  0xec   :  { %v812_v56 = vadd.f32 %v811_v53, %v799_v54 }
  0xf0   :  { %v800_v57 = vpop.f32.mrf.mxu3  ;;  %v824_v59 = vpop.f32.mrf.mxu0 }
  0xf1   :  { %v825_v60 = vadd.f32 %v824_v59, %v812_v56 }
  0xf3   :  { %v813_v61 = vpop.f32.mrf.mxu2  ;;  %v829_v62 = vmax.f32 %v825_v60, 0.0 }
  0xf5   :  { %v831_v63 = vpack.c.bf16 %v829_v62, %v829_v62 }
  0xf7   :  { %985 = vmatmul.bf16.vlgmr.msrb.gmra.mxu3 %v831_v63 }
  0xf8   :  { %v826_v0 = vpop.f32.mrf.mxu0 }
 0x149   :  { %v973_v2 = vpop.f32.mrf.mxu1 }
 0x14a   :  { %v974_v10 = vadd.f32 %v1793_v9, %v973_v2 }
 0x151   :  { %v975_v4 = vpop.f32.mrf.mxu1 }
 0x17a   :  { %v986_v11 = vpop.f32.mrf.mxu3 }
 0x17b   :  { %v987_v12 = vadd.f32 %v986_v11, %v974_v10 }
 0x17d   :  { %v990_v13 = vmax.f32 %v987_v12, 0.0 }
 0x17f   :  { %v991_v14 = vpack.c.bf16 %v990_v13, %v990_v13 }
 0x181   :  { %1068 = vmatmul.bf16.vlgmr.msra.gmra.mxu0 %v991_v14 }
 0x182   :  { %v988_v15 = vpop.f32.mrf.mxu3 }
 0x1fe   :  { %v1069_v18 = vpop.f32.mrf.mxu0 }
 0x1ff   :  { %v1070_v19 = vadd.f32 %v1794_v17, %v1069_v18 }
 0x201   :  { %v1073_v20 = vmax.f32 %v1070_v19, 0.0 }
 0x203   :  { %v1074_v21 = vpack.c.bf16 %v1073_v20, %v1073_v20 }
 0x205   :  { %1665 = vmatmul.msk.bf16.vlgmr.msra.gmra.mxu2 %vm1111_vm1, %v1074_v21 }
 0x206   :  { %v1071_v22 = vpop.f32.mrf.mxu0 }
 0x288   :  { %v1124_v24 = vpop.f32.mrf.mxu2 }
 0x289   :  { %v1125_v25 = vadd.f32 %v1795_v23, %v1124_v24 }
 0x28b   :  { %v1128_v26 = vmax.f32 %v1125_v25, 0.0 }
 0x28d   :  { %v1130_v27 = vsel %vm1129_vm2, %v1128_v26, -inf }
 0x28e   :  { %1131 = vmax.xlane.f32.xlu0 %v1130_v27 }
 0x290   :  { %v1126_v28 = vpop.f32.mrf.mxu2 }
 0x301   :  { %v1132_v29 = vpop.xlane.xlu0 %1131 }
 0x302   :  { %v1133_v31 = vsub.f32 %v1128_v26, %v1132_v29 }
 0x304   :  { %v1134_v32 = vmul.f32 1.442695, %v1133_v31 }
 0x306   :  { %1796 = vpow2.f32 %v1134_v32 }
 0x30c   :  { %v1797_v33 = vpop.eup %1796 }
 0x30d   :  { %v1136_v34 = vsel %vm1129_vm2, %v1797_v33, 0.0 }
 0x30e   :  { %1137 = vadd.xlane.f32.xlu0 %v1136_v34 }
 0x381   :  { %v1138_v35 = vpop.xlane.xlu0 %1137 }
 0x382   :  { %1798 = vlog2.f32 %v1138_v35 }
 0x388   :  { %v1799_v36 = vpop.eup %1798 }
 0x389   :  { %v1140_v38 = vmul.f32 0.6931472, %v1799_v36 }
 0x38b   :  { %v1141_v39 = vsub.f32 %v1133_v31, %v1140_v38 }
 0x38d   :  { %1142 = vst.msk [vmem:[#allocation2] sm:$0xff] %vm1129_vm2, %v1141_v39 }
 0x38e   :  { %1153 = dma.vmem_to_hbm [thread:$0]  %s1149_s7, 128, %s1151_s22, [#allocation3]  }
 0x38f   :  { %1824 = dma.done.wait [#allocation3], 128  }
 0x390   :  { %1825 = vsyncadd [#allocation3], 4294967168 }
 0x391   :  { %1158 = vsyncpa [#allocation3], 1 }

</bundles_post_ra>
